<compile_context>
chip_gen: v6e
topology: v6e:2x2x1
jax: 0.10.0
libtpu: 0.0.40
codegen_flags: <defaults>
</compile_context>

<pallas_src>
import jax
import jax.numpy as jnp
from jax import lax
from jax.experimental import pallas as pl
from jax.experimental.pallas import tpu as pltpu


def _pa_kernel(x_ref, w1_ref, b1_ref, w2_ref, b2_ref, o_ref):
    # x_ref:  (nb, C, T)   pixels on the lane axis, channels on sublanes
    # w1_ref: (Ch, C)      conv1 weight (transposed for (Ch,C)@(C,T))
    # b1_ref: (Ch, 1)
    # w2_ref: (Ch, 1)
    # b2_ref: (1,)         scalar bias in SMEM
    # o_ref:  (nb, C, T)
    nb = x_ref.shape[0]

    def body(b, carry):
        x = x_ref[b]                                                      # (C, T)
        h = jnp.dot(w1_ref[...], x, preferred_element_type=jnp.float32)   # (Ch, T)
        h = jnp.maximum(h + b1_ref[...], 0.0)                             # ReLU
        # conv2 (1x1 -> 1 channel): VPU multiply + sublane reduce (no MXU).
        y = jnp.sum(h * w2_ref[...], axis=0, keepdims=True) + b2_ref[0]   # (1, T)
        y = jax.nn.sigmoid(y)
        o_ref[b] = (x * y).astype(o_ref.dtype)                            # bcast over C
        return carry

    lax.fori_loop(0, nb, body, 0, unroll=(nb <= 4))


def pa_layer(x_nchw, w1, b1, w2, b2, *, target_block_bytes=2 << 20):
    """PALayer forward.

    x_nchw: (N, C, H, W) float32
    w1:     (C, C//8)    -- conv1 weight, transposed, squeezed 1x1 taps
    b1:     (C//8,)
    w2:     (C//8, 1)    -- conv2 weight, transposed, squeezed 1x1 taps
    b2:     (1,)
    """
    N, C, H, W = x_nchw.shape
    Ch = w1.shape[1]
    HW = H * W
    itemsize = jnp.dtype(x_nchw.dtype).itemsize

    # NCHW -> (N, C, HW): a free view, no transpose, no padded copy.
    x_flat = x_nchw.reshape(N, C, HW)

    # ---- Block sizing by byte budget (no padding; partial tails are masked) ----
    bytes_per_image = C * HW * itemsize
    if bytes_per_image >= target_block_bytes:
        # Large image: one image per block, tile the spatial (lane) axis.
        nb = 1
        tile_hw = (target_block_bytes // (C * itemsize)) // 128 * 128
        tile_hw = max(128, tile_hw)
        if tile_hw >= HW:
            tile_hw = HW            # full extent: no 128-divisibility needed
    else:
        # Small image: full image per block, fold batch elements to reach budget.
        tile_hw = HW
        nb = int(max(1, min(N, target_block_bytes // max(1, bytes_per_image))))

    gb = pl.cdiv(N, nb)
    gj = pl.cdiv(HW, tile_hw)

    # Keep >= 4 grid steps so a 2-TC chip (v7x megacore) has work on both cores.
    while gb * gj < 4:
        if nb > 1:
            nb = -(-nb // 2)                       # ceil halve
            gb = pl.cdiv(N, nb)
        else:
            new_tile = ((-(-tile_hw // 2)) // 128) * 128
            if 128 <= new_tile < tile_hw:          # stays a multiple of 128
                tile_hw = new_tile
                gj = pl.cdiv(HW, tile_hw)
            else:
                break

    # ---- Parameters: small, resident in VMEM; scalar bias in SMEM ----
    w1t = jnp.transpose(w1)          # (Ch, C)
    b1_col = b1.reshape(Ch, 1)       # (Ch, 1)
    w2_col = w2.reshape(Ch, 1)       # (Ch, 1)
    b2_s = b2.reshape(1)             # (1,)  -> SMEM

    # ---- VMEM budget: in + out blocks, double-buffered, + weights + headroom ----
    block_bytes = nb * C * tile_hw * itemsize
    weight_bytes = (Ch * C + 2 * Ch) * 4
    vmem_needed = 4 * block_bytes + 2 * weight_bytes + (1 << 20)
    try:
        vmem_cap = int(pltpu.get_tpu_info().vmem_capacity_bytes)
    except Exception:
        vmem_cap = 64 << 20          # conservative (v7x-sized) fallback
    vmem_limit = int(min(max(vmem_needed, 32 << 20), int(vmem_cap * 0.75)))

    cost = pl.CostEstimate(
        flops=int(2 * N * HW * C * Ch + 2 * N * HW * Ch + N * HW * C),
        transcendentals=int(N * HW),
        bytes_accessed=int(2 * N * C * HW * itemsize + weight_bytes),
    )

    out_flat = pl.pallas_call(
        _pa_kernel,
        out_shape=jax.ShapeDtypeStruct((N, C, HW), x_flat.dtype),
        grid_spec=pltpu.PrefetchScalarGridSpec(
            num_scalar_prefetch=0,
            grid=(gb, gj),
            in_specs=[
                # x block: nb images, channels on sublanes, pixels on lanes.
                pl.BlockSpec((nb, C, tile_hw), lambda b, j: (b, 0, j)),
                # Small params: resident in VMEM across the whole grid.
                pl.BlockSpec((Ch, C), lambda b, j: (0, 0)),
                pl.BlockSpec((Ch, 1), lambda b, j: (0, 0)),
                pl.BlockSpec((Ch, 1), lambda b, j: (0, 0)),
                # Scalar bias in SMEM (no VMEM tile / per-step DMA).
                pl.BlockSpec(memory_space=pltpu.MemorySpace.SMEM),
            ],
            out_specs=pl.BlockSpec((nb, C, tile_hw), lambda b, j: (b, 0, j)),
        ),
        compiler_params=pltpu.CompilerParams(
            dimension_semantics=("parallel", "parallel"),
            vmem_limit_bytes=vmem_limit,
        ),
        cost_estimate=cost,
    )(x_flat, w1t, b1_col, w2_col, b2_s)

    return out_flat.reshape(N, C, H, W)


def pa_layer_ref(x_nchw, w1, b1, w2, b2):
    """Pure-JAX reference (matches PyTorch PALayer.forward)."""
    N, C, H, W = x_nchw.shape
    x_pc = jnp.transpose(x_nchw, (0, 2, 3, 1)).reshape(-1, C)
    h = jnp.maximum(x_pc @ w1 + b1[None, :], 0.0)
    y = jax.nn.sigmoid(h @ w2 + b2[None, :])
    out = x_pc * y
    return jnp.transpose(out.reshape(N, H, W, C), (0, 3, 1, 2))


if __name__ == "__main__":
    key = jax.random.PRNGKey(0)
    k_x, k_w1, k_b1, k_w2, k_b2, k_x2 = jax.random.split(key, 6)

    # Small shapes consistent with PALayer: channel must be >= 8.
    N, C, H, W = 2, 16, 16, 16
    Ch = C // 8

    x = jax.random.normal(k_x, (N, C, H, W), dtype=jnp.float32)

    # Deterministic synthetic parameters (Conv2d 1x1 weights, stored transposed).
    w1 = 0.1 * jax.random.normal(k_w1, (C, Ch), dtype=jnp.float32)
    b1 = 0.1 * jax.random.normal(k_b1, (Ch,), dtype=jnp.float32)
    w2 = 0.1 * jax.random.normal(k_w2, (Ch, 1), dtype=jnp.float32)
    b2 = 0.1 * jax.random.normal(k_b2, (1,), dtype=jnp.float32)

    out = jax.block_until_ready(pa_layer(x, w1, b1, w2, b2))
    ref = jax.block_until_ready(pa_layer_ref(x, w1, b1, w2, b2))
    assert out.shape == x.shape
    assert jnp.allclose(out, ref, atol=1e-5, rtol=1e-5), "mismatch vs reference"

    # Second check: spatial size not a multiple of the lane tile -> exercises
    # the pad-free partial tail-block path (masked stores, no jnp.pad/slice).
    N2, H2, W2 = 3, 18, 15
    x2 = jax.random.normal(k_x2, (N2, C, H2, W2), dtype=jnp.float32)
    out2 = jax.block_until_ready(pa_layer(x2, w1, b1, w2, b2))
    ref2 = jax.block_until_ready(pa_layer_ref(x2, w1, b1, w2, b2))
    assert out2.shape == x2.shape
    assert jnp.allclose(out2, ref2, atol=1e-5, rtol=1e-5), "mismatch (odd shape)"

    print("KERNEL_OK")
</pallas_src>

<mosaic_0001>
module attributes {stable_mosaic.version = 11 : i64} {
  func.func @_pa_kernel(%arg0: i32, %arg1: i32, %arg2: memref<1x16x128xf32, #tpu.memory_space<vmem>>, %arg3: memref<2x16xf32, #tpu.memory_space<vmem>>, %arg4: memref<2x1xf32, #tpu.memory_space<vmem>>, %arg5: memref<2x1xf32, #tpu.memory_space<vmem>>, %arg6: memref<1xf32, #tpu.memory_space<smem>>, %arg7: memref<1x16x128xf32, #tpu.memory_space<vmem>>) attributes {dimension_semantics = [#tpu.dimension_semantics<parallel>, #tpu.dimension_semantics<parallel>], iteration_bounds = array<i64: 2, 2>, scalar_prefetch = 0 : i64, scratch_operands = 0 : i64, tpu.core_type = #tpu.core_type<tc>, window_params = [{transform_indices = @transform_0, window_bounds = array<i64: 1, 16, 128>}, {pipeline_mode = #tpu.pipeline_mode<synchronous>, transform_indices = @transform_1, window_bounds = array<i64: 2, 16>}, {pipeline_mode = #tpu.pipeline_mode<synchronous>, transform_indices = @transform_2, window_bounds = array<i64: 2, 1>}, {pipeline_mode = #tpu.pipeline_mode<synchronous>, transform_indices = @transform_3, window_bounds = array<i64: 2, 1>}, {transform_indices = @transform_4, window_bounds = array<i64: 1>}, {transform_indices = @transform_5, window_bounds = array<i64: 1, 16, 128>}]} {
    %c0_i32 = arith.constant 0 : i32
    %0 = arith.index_cast %c0_i32 : i32 to index
    %c0 = arith.constant 0 : index
    %c0_0 = arith.constant 0 : index
    %1 = vector.load %arg2[%0, %c0, %c0_0] : memref<1x16x128xf32, #tpu.memory_space<vmem>>, vector<1x16x128xf32>
    %2 = vector.shape_cast %1 : vector<1x16x128xf32> to vector<16x128xf32>
    %c0_1 = arith.constant 0 : index
    %c0_2 = arith.constant 0 : index
    %3 = vector.load %arg3[%c0_1, %c0_2] : memref<2x16xf32, #tpu.memory_space<vmem>>, vector<2x16xf32>
    %cst = arith.constant dense<0.000000e+00> : vector<2x128xf32>
    %4 = tpu.matmul %3, %2, %cst {dimension_numbers = #tpu.dot_dimension_numbers<[1], [0], [0], [1], [0, 0, 1, 1], [], []>} : vector<2x16xf32>, vector<16x128xf32>, vector<2x128xf32> -> vector<2x128xf32>
    %c0_3 = arith.constant 0 : index
    %c0_4 = arith.constant 0 : index
    %5 = vector.load %arg4[%c0_3, %c0_4] : memref<2x1xf32, #tpu.memory_space<vmem>>, vector<2x1xf32>
    %6 = vector.broadcast %5 : vector<2x1xf32> to vector<2x128xf32>
    %7 = arith.addf %4, %6 : vector<2x128xf32>
    %cst_5 = arith.constant 0.000000e+00 : f32
    %8 = vector.broadcast %cst_5 : f32 to vector<2x128xf32>
    %9 = arith.maximumf %7, %8 : vector<2x128xf32>
    %c0_6 = arith.constant 0 : index
    %c0_7 = arith.constant 0 : index
    %10 = vector.load %arg5[%c0_6, %c0_7] : memref<2x1xf32, #tpu.memory_space<vmem>>, vector<2x1xf32>
    %11 = vector.broadcast %10 : vector<2x1xf32> to vector<2x128xf32>
    %12 = arith.mulf %9, %11 : vector<2x128xf32>
    %cst_8 = arith.constant dense<0.000000e+00> : vector<128xf32>
    %13 = vector.multi_reduction <add>, %12, %cst_8 [0] : vector<2x128xf32> to vector<128xf32>
    %14 = vector.shape_cast %13 : vector<128xf32> to vector<1x128xf32>
    %c0_9 = arith.constant 0 : index
    %15 = memref.load %arg6[%c0_9] : memref<1xf32, #tpu.memory_space<smem>>
    %16 = vector.broadcast %15 : f32 to vector<1x128xf32>
    %17 = arith.addf %14, %16 : vector<1x128xf32>
    %18 = arith.negf %17 : vector<1x128xf32>
    %19 = math.exp %18 : vector<1x128xf32>
    %cst_10 = arith.constant 1.000000e+00 : f32
    %20 = vector.broadcast %cst_10 : f32 to vector<1x128xf32>
    %21 = arith.addf %20, %19 : vector<1x128xf32>
    %22 = arith.divf %20, %21 : vector<1x128xf32>
    %23 = vector.broadcast %22 : vector<1x128xf32> to vector<16x128xf32>
    %24 = arith.mulf %2, %23 : vector<16x128xf32>
    %25 = arith.index_cast %c0_i32 : i32 to index
    %c0_11 = arith.constant 0 : index
    %c0_12 = arith.constant 0 : index
    %26 = vector.load %arg7[%25, %c0_11, %c0_12] : memref<1x16x128xf32, #tpu.memory_space<vmem>>, vector<1x16x128xf32>
    %27 = vector.shape_cast %26 : vector<1x16x128xf32> to vector<16x128xf32>
    %28 = vector.shape_cast %24 : vector<16x128xf32> to vector<1x16x128xf32>
    tpu.vector_store %arg7[%25, %c0_11, %c0_12], %28 {strides = array<i32>} : memref<1x16x128xf32, #tpu.memory_space<vmem>>, vector<1x16x128xf32>,
    %c1_i32 = arith.constant 1 : i32
    return
  }
  func.func @transform_0(%arg0: i32, %arg1: i32) -> (i32, i32, i32) {
    %c0_i32 = arith.constant 0 : i32
    %c0_i32_0 = arith.constant 0 : i32
    return %arg0, %c0_i32, %arg1 : i32, i32, i32
  }
  func.func @transform_1(%arg0: i32, %arg1: i32) -> (i32, i32) {
    %c0_i32 = arith.constant 0 : i32
    %c0_i32_0 = arith.constant 0 : i32
    %c0_i32_1 = arith.constant 0 : i32
    return %c0_i32, %c0_i32_0 : i32, i32
  }
  func.func @transform_2(%arg0: i32, %arg1: i32) -> (i32, i32) {
    %c0_i32 = arith.constant 0 : i32
    %c0_i32_0 = arith.constant 0 : i32
    %c0_i32_1 = arith.constant 0 : i32
    return %c0_i32, %c0_i32_0 : i32, i32
  }
  func.func @transform_3(%arg0: i32, %arg1: i32) -> (i32, i32) {
    %c0_i32 = arith.constant 0 : i32
    %c0_i32_0 = arith.constant 0 : i32
    %c0_i32_1 = arith.constant 0 : i32
    return %c0_i32, %c0_i32_0 : i32, i32
  }
  func.func @transform_4(%arg0: i32, %arg1: i32) -> i32 {
    %c0_i32 = arith.constant 0 : i32
    %c0_i32_0 = arith.constant 0 : i32
    return %c0_i32 : i32
  }
  func.func @transform_5(%arg0: i32, %arg1: i32) -> (i32, i32, i32) {
    %c0_i32 = arith.constant 0 : i32
    %c0_i32_0 = arith.constant 0 : i32
    return %arg0, %c0_i32, %arg1 : i32, i32, i32
  }
}

</mosaic_0001>

<bundles_post_ra>
// kernel: tpu_custom_call.1
= control target key start
LH: loop header
LB: loop body
LE: loop exit
PB: predicated region body
PF: predicated region fallthrough
CT: control target
= control target key end

     0   :  { %s944_s0 = inlined_call_operand.hbm [shape: f32[2,16,256], index: 0, kind: input, shape index: {}]   ;;  %s945_s1 = inlined_call_operand.vmem [shape: f32[2,16], index: 1, kind: input, shape index: {}]   ;;  %s946_s2 = inlined_call_operand.vmem [shape: f32[2,1], index: 2, kind: input, shape index: {}]   ;;  %s947_s3 = inlined_call_operand.vmem [shape: f32[2,1], index: 3, kind: input, shape index: {}]   ;;  %s948_s4 = inlined_call_operand.<no memory space> [shape: f32[1], index: 4, kind: input, shape index: {}]   ;;  %s949_s5 = inlined_call_operand.hbm [shape: f32[2,16,256], index: 5, kind: output, shape index: {}]  }
   0x1   :  { %10 = sst [smem:[#allocation2]] %s948_s4 }
   0x2   :  { %11 = vsyncpa [#allocation4], 0 }
   0x3   :  { %13 = vsyncpa [#allocation4 + $0x1], 0 }
   0x4   :  { %14 = vsyncpa [#allocation5], 0 }
   0x5   :  { %16 = vsyncpa [#allocation5 + $0x1], 0  ;;  %s765_s20 = smov 0   ;;  %s767_s21 = smov 0  }
   0x6   :  { %s769_s22 = smov 0   ;;  %s771_s23 = smov 0  }
   0x7   :  { %s773_s24 = smov 0   ;;  %s775_s25 = smov 0  }
   0x8   :  { %s777_s26 = smov 0   ;;  %s779_s27 = smov 0  }
   0x9 LB: > { %953 = sst [smem:[#allocation9_spill]] %s691_s20  ;;  %s476_s4 = sadd.s32 4294967295, %s719_s27   ;;  %s719_s27 = sphi %s779_s27, %s22_s27   ;;  %s715_s26 = sphi %s777_s26, %s970_s26   ;;  %s711_s25 = sphi %s775_s25, %s969_s25   ;;  %s707_s24 = sphi %s773_s24, %s968_s24   ;;  %s703_s23 = sphi %s771_s23, %s967_s23   ;;  %s699_s22 = sphi %s769_s22, %s966_s22   ;;  %s695_s21 = sphi %s767_s21, %s965_s21   ;;  %s691_s20 = sphi %s765_s20, %s964_s20  }
   0xa   : > { %s477_s28 = sadd.s32 4294967294, %s719_s27   ;;  %s31_s29 = sadd.s32 1, %s711_s25 }
   0xb   : > { %s34_s30 = sadd.s32 1, %s715_s26  ;;  %p32_p0 = scmp.ge.s32.totalorder %s31_s29, 2 }
   0xc   : > { %s43_s6 = sadd.s32 1, %s699_s22  ;;  %p50_p1 = scmp.ne.s32.totalorder %s699_s22, %s695_s21 }
   0xd   : > { %p51_p2 = scmp.eq.s32.totalorder %s719_s27, 0  ;;  %s972_s29 = smov (%p32_p0, %s31_s29), 0 }
   0xe   : > { %954 = sst [smem:[#allocation10_spill]] %s972_s29  ;;  %s974_s30 = smov (!%p32_p0, %s34_s30), %s715_s26 }
   0xf   : > { %s39_s7 = ssub.s32 %s711_s25, %s972_s29  ;;  %p818_p3 = por %p51_p2, %p50_p1 }
  0x10   : > { %p36_p4 = scmp.ge.s32.totalorder %s974_s30, 2  ;;  %p56_p5 = scmp.ne.s32.totalorder %s695_s21, %s691_s20 }
  0x11   : > { %p57_p6 = scmp.eq.s32.totalorder %s476_s4, 0  ;;  %p166_p7 = scmp.eq.s32.totalorder %s476_s4, 3 }
  0x12   : > { %s976_s30 = smov (%p36_p4, %s974_s30), 0  ;;  %p172_p10 = scmp.eq.s32.totalorder %s477_s28, 3 }
  0x13   : > { %956 = sst [smem:[#allocation11_spill]] %s976_s30  ;;  %p826_p8 = por %p57_p6, %p56_p5 }
  0x14   : > { %p830_p9 = por %p166_p7, %p50_p1  ;;  %s38_s11 = ssub.s32 %s715_s26, %s976_s30 }
  0x15   : > { %s40_s12 = sor.u32 %s39_s7, %s38_s11  ;;  %p836_p12 = por %p172_p10, %p56_p5 }
  0x16   : > { %p41_p11 = scmp.eq.s32.totalorder %s40_s12, 0  ;;  %p515_p13 = scmp.lt.s32.totalorder %s719_s27, 4 }
  0x17   : > { %s204_s14 = sand.u32 1, %s699_s22   ;;  %s481_s17 = sshll.u32 %s715_s26, 2 }
  0x18   : > { %s843_s15 = scalar_select %p41_p11, %s699_s22, %s43_s6  }
  0x19   : > { %s480_s16 = sshll.u32 %s204_s14, 4  ;;  %s213_s18 = sadd.s32 %s711_s25, %s481_s17 }
  0x1a   : > { %s208_s19 = scalar_lea.vmem [#allocation3], %s480_s16  ;;  %s482_s29 = sshll.u32 %s213_s18, 7 }
  0x1b   : > { %s216_s4 = sshll.u32 %s208_s19, 4  ;;  %s215_s28 = scalar_lea.hbm %s944_s0, %s482_s29  ;;  %s217_s4 = int_to_ptr.vmem [resolvable:$true] %s216_s4 }
  0x1c   : > { %p852_p0 = pnand %p515_p13, %p818_p3  ;;  %s205_s11 = scalar_lea.sflag [#allocation4], %s204_s14 }
  0x1d   : > { %s608_s6 = scalar_lea.vmem %s217_s4, 256  ;;  %s721_s12 = smov [#allocation3]  }
  0x1e   : > { %p597_p1 = pneg %p852_p0  ;;  %p609_p2 = scmp.ne.s32.totalorder %s217_s4, %s608_s6 }
  0x1f   : > { %s613_s16 = sshll.u32 %s721_s12, 4  ;;  %s614_s16 = int_to_ptr.vmem [resolvable:$false] %s613_s16 }
  0x20   : > { %p611_p4 = pnand %p609_p2, %p597_p1  ;;  %s615_s17 = scalar_lea.vmem %s614_s16, 512 }
  0x21   : > { %p616_p6 = scmp.lt.s32.totalorder %s217_s4, %s614_s16  ;;  %p617_p7 = scmp.lt.s32.totalorder %s615_s17, %s608_s6 }
  0x22   : > { %p612_p5 = pneg %p611_p4 }
  0x23   : > { %p618_p10 = por %p617_p7, %p616_p6 }
  0x25   : > { %p619_p11 = pnand %p618_p10, %p612_p5 }
  0x27   : > { %622 = shalt.err (!%p619_p11)
}
  0x28   : > { %s722_s20 = smov 256   ;;  %s723_s29 = smov 128  }
  0x29   : > { %s724_s30 = smov 8   ;;  %p483_p3 = scmp.ge.s32.totalorder %s719_s27, 1 }
  0x2a   : > { %510 = dma.hbm_to_vmem [thread:$0]  (!%p852_p0), %s215_s28, 256, %s217_s4, %s205_s11, %s722_s20, %s723_s29, %s724_s30  }
  0x2b   : > { %p224_p13 = scmp.lt.s32.totalorder %s719_s27, 5 }
  0x2d   : > { %p225_p1 = pnand %p483_p3, %p224_p13 }
  0x2e   : > { %s863_s8 = sand.u32 (!%p225_p1), 1, %s695_s21  }
  0x2f   : > { %228 = sbr.rel (%p225_p1) target bundleno = 321 (0x141), region = 40  ;;  %s484_s14 = sshll.u32 (!%p225_p1), %s863_s8, 4 }
  0x30   : > { %s231_s18 = scalar_lea.sflag (!%p225_p1), [#allocation4], %s863_s8  ;;  %s234_s19 = scalar_lea.vmem (!%p225_p1), [#allocation3], %s484_s14 }
  0x34   : > { %682 = dma.done.wait (%p826_p8), %s231_s18, 256  }
  0x35   : > { %684 = vsyncadd (%p826_p8), %s231_s18, 4294967040  ;;  %v725_v0 = vmov 0.0   ;;  %vm726_vm0 = vmmov 0   ;;  %v727_v1 = vmov 0   ;;  %v262_v2 = vld [vmem:[%s234_s19 + $0x8] sm:$0xff]  ;;  %v261_v3 = vld [vmem:[%s234_s19] sm:$0xff] }
  0x36   : > { %496 = vmatprep.subr.mxu0 %v725_v0  ;;  %500 = vmatprep.mubr.msk.f32.mxu0 %vm726_vm0, %v725_v0  ;;  %v263_v4 = vld [vmem:[%s945_s1] sm:$0x3]  ;;  %vm270_vm1 = vcmask 130048   ;;  %vm352_vm2 = vcmask 1041408   ;;  %s360_s12 = sld [smem:[#allocation2]]  ;;  %s489_s16 = sshll.u32 %s707_s24, 2 }
  0x37   : > { %590 = vset.pattern.permute.xlu0 %v727_v1  ;;  %497 = vmatpush3.msra.mxu0 %v262_v2  ;;  %v264_v5 = vld [vmem:[%s946_s2] sm:$0x3]  ;;  %s385_s17 = sadd.s32 %s703_s23, %s489_s16  ;;  %s260_s29 = scalar_lea.vmem [#allocation6], %s484_s14 }
  0x38   : > { %498 = vmatprep.subr.mxu0 %v725_v0  ;;  %267 = vperm.xlu0 %590, %v264_v5   ;;  %v345_v6 = vld [vmem:[%s947_s3] sm:$0x3]  ;;  %s490_s20 = sshll.u32 %s385_s17, 7  ;;  %s388_s30 = sshll.u32 %s260_s29, 4  ;;  %s891_s30 = int_to_ptr.vmem [resolvable:$true] %s388_s30 }
  0x39   : > { %499 = vmatpush3.msra.mxu0 %v261_v3  ;;  %s889_s4 = scalar_lea.hbm %s949_s5, %s490_s20  ;;  %s374_s23 = scalar_lea.sflag [#allocation5], %s863_s8 }
  0x3a   : > { %501 = vmatmul.mubr.msk.f32.vlgmr.msra.gmra.mxu0 %vm270_vm1, %v263_v4  ;;  %s623_s24 = scalar_lea.vmem %s891_s30, 256  ;;  %s728_s14 = smov [#allocation6]  }
  0x3b   : > { %p624_p8 = scmp.ne.s32.totalorder %s891_s30, %s623_s24  ;;  %s627_s28 = sshll.u32 %s728_s14, 4  ;;  %s628_s28 = int_to_ptr.vmem [resolvable:$false] %s627_s28 }
  0x3c   : > { %348 = vperm.xlu0 %590, %v345_v6   ;;  %v361_v20 = vstv %s360_s12  ;;  %s629_s7 = scalar_lea.vmem %s628_s28, 512  ;;  %p630_p4 = scmp.lt.s32.totalorder %s891_s30, %s628_s28 }
  0x3d   : > { %p625_p0 = pnand %p624_p8, %p830_p9  ;;  %p631_p5 = scmp.lt.s32.totalorder %s629_s7, %s623_s24 }
  0x3f   : > { %p626_p2 = pneg %p625_p0  ;;  %p632_p6 = por %p631_p5, %p630_p4 }
  0x41   : > { %p633_p7 = pnand %p632_p6, %p626_p2 }
  0xb3   : > { %v268_v7 = vpop.permute.xlu0 %267 }
  0xb7   : > { %v349_v12 = vpop.permute.xlu0 %348 }
  0xfa   : > { %v340_v8 = vpop.f32.mrf.mxu0 }
  0xfb   : > { %v341_v9 = vadd.f32 %v340_v8, %v268_v7 }
  0xfc   : > { %v502_v10 = vpop.f32.mrf.mxu0 }
  0xfd   : > { %v344_v11 = vmax.f32 %v341_v9, 0.0 }
  0xff   : > { %v351_v13 = vmul.f32 %v349_v12, %v344_v11 }
 0x101   : > { %v353_v14 = vsel %vm352_vm2, %v351_v13, 0.0 }
 0x102   : > { %v354_v15 = vrot.slane %v353_v14, 4 }
 0x104   : > { %v355_v16 = vadd.f32 %v354_v15, %v353_v14 }
 0x106   : > { %v356_v17 = vrot.slane %v355_v16, 2 }
 0x108   : > { %v357_v18 = vadd.f32 %v356_v17, %v355_v16 }
 0x10a   : > { %v358_v19 = vrot.slane %v357_v18, 1 }
 0x10c   : > { %v359_v21 = vadd.f32 %v358_v19, %v357_v18 }
 0x10e   : > { %v362_v22 = vadd.f32 %v361_v20, %v359_v21 }
 0x110   : > { %v487_v23 = vmul.f32 -1.442695, %v362_v22 }
 0x112   : > { %591 = vpow2.f32 %v487_v23 }
 0x11f   : > { %v592_v24 = vpop.eup %591 }
 0x120   : > { %v366_v25 = vadd.f32 1.0, %v592_v24 }
 0x122   : > { %593 = vrcp.f32 %v366_v25 }
 0x12f   : > { %v594_v26 = vpop.eup %593 }
 0x130   : > { %v369_v27 = vmul.f32 %v594_v26, %v261_v3  ;;  %v370_v28 = vmul.f32 %v594_v26, %v262_v2 }
 0x132   : > { %371 = vst [vmem:[%s260_s29] sm:$0xff] %v369_v27  ;;  %372 = vst [vmem:[%s260_s29 + $0x8] sm:$0xff] %v370_v28 }
 0x133   : > { %636 = shalt.err (!%p633_p7)
}
 0x134   : > { %s637_s11 = scalar_lea.hbm %s889_s4, 256  ;;  %s641_s12 = scalar_lea.hbm %s949_s5, 1024 }
 0x135   : > { %p638_p10 = scmp.ne.s32.totalorder %s889_s4, %s637_s11  ;;  %p642_p13 = scmp.lt.s32.totalorder %s889_s4, %s949_s5 }
 0x136   : > { %p643_p1 = scmp.lt.s32.totalorder %s641_s12, %s637_s11 }
 0x137   : > { %p639_p11 = pnand %p638_p10, %p830_p9 }
 0x138   : > { %p644_p8 = por %p643_p1, %p642_p13 }
 0x139   : > { %p640_p3 = pneg %p639_p11 }
 0x13b   : > { %p645_p0 = pnand %p644_p8, %p640_p3 }
 0x13d   : > { %648 = shalt.err (!%p645_p0)
}
 0x13e   : > { %s729_s20 = smov 128   ;;  %s730_s29 = smov 256  }
 0x13f   : > { %s731_s18 = smov 8  }
 0x140   : > { %505 = dma.vmem_to_hbm [thread:$0]  (%p830_p9), %s891_s30, 256, %s889_s4, %s374_s23, %s729_s20, %s730_s29, %s731_s18  }
 0x141 PF: > { %s961_s19 = sld [smem:[#allocation9_spill]]  ;;  %p516_p2 = scmp.ge.s32.totalorder %s719_s27, 2 }
 0x143   : > { %p512_p4 = pnand %p516_p2, %p836_p12 }
 0x145   : > { %p513_p5 = pneg %p512_p4 }
 0x147   : > { %s403_s24 = sand.u32 1, %s961_s19  }
 0x148   : > { %s404_s14 = scalar_lea.sflag [#allocation5], %s403_s24 }
 0x149   : > { %686 = dma.done.wait (%p513_p5), %s404_s14, 256  }
 0x14a   : > { %688 = vsyncadd (%p513_p5), %s404_s14, 4294967040  ;;  %s22_s27 = sadd.s32 1, %s719_s27   ;;  %s962_s10 = sld [smem:[#allocation10_spill]] }
 0x14b   : > { %p19_p6 = scmp.ge.s32.totalorder %s22_s27, 6   ;;  %s963_s8 = sld [smem:[#allocation11_spill]] }
 0x14c   : > { %s964_s20 = smov %s695_s21  ;;  %s965_s21 = smov %s699_s22 }
 0x14d   : > { %s966_s22 = smov %s843_s15  ;;  %s967_s23 = smov %s711_s25 }
 0x14e   : > { %s968_s24 = smov %s715_s26  ;;  %21 = sbr.rel (!%p19_p6) target bundleno = 9 (0x9), region = 85 }
 0x150   : > { %s969_s25 = smov %s962_s10 }
 0x151   : > { %s970_s26 = smov %s963_s8 }
 0x153   :  { %409 = vsyncpa [#allocation4], 1 }
 0x154   :  { %411 = vsyncpa [#allocation4 + $0x1], 1 }
 0x155   :  { %412 = vsyncpa [#allocation5], 1 }
 0x156   :  { %414 = vsyncpa [#allocation5 + $0x1], 1 }

</bundles_post_ra>
